<compile_context>
chip_gen: v5e
topology: v5e:2x2
jax: 0.10.0
libtpu: 0.0.40
codegen_flags: <defaults>
</compile_context>

<pallas_src>
import jax
import jax.numpy as jnp
from jax.experimental import pallas as pl
from jax.experimental.pallas import tpu as pltpu

L = 24          # hours per day (fixed by the model's forward)
KSIZE = 5
BN_EPS = 1e-5


def _make_kernel(nb_layer, rows, gpack):
    inv_n = 1.0 / float(rows * gpack)        # BN element count per channel = batch * 24

    def kernel(*refs):
        x_ref, masks_ref = refs[0], refs[1]
        layer_refs = [refs[2 + 4 * i: 6 + 4 * i] for i in range(nb_layer)]  # (w_wide, gamma_beta, S, St)
        wl_ref = refs[2 + 4 * nb_layer]      # (G*Cf, 5*G)  last-layer block-diag taps
        blast_ref = refs[3 + 4 * nb_layer]   # (1, 1)       last-layer bias
        out_ref = refs[4 + 4 * nb_layer]     # (rows, G)

        m_all = masks_ref[...]                                 # (rows, 6)
        tap_m = [m_all[:, k:k + 1] for k in range(KSIZE)]      # per-tap validity (hour-index only)
        pred_m = m_all[:, KSIZE:KSIZE + 1]                     # hours [6, 21) mask

        def conv_same(x, w_ref):
            # One MXU matmul for all 5 taps; taps are the column blocks of w_ref (G*Cin, 5*G*Cout).
            wide = w_ref.shape[1]
            cg = wide // KSIZE                                 # G * Cout
            z = jnp.dot(x.astype(w_ref.dtype), w_ref[...],
                        preferred_element_type=jnp.float32)    # (rows, 5*G*Cout), f32 accum
            # y[r] = sum_k mask_k[r] * z[r + (k-2), tap-k block]: in-register sublane roll (XLU);
            # tap masks zero every row whose shifted source crosses a sample / array boundary.
            acc = z[:, 2 * cg:3 * cg]                          # centre tap: mask identically 1
            for k in (0, 1, 3, 4):
                zk = pltpu.roll(z[:, k * cg:(k + 1) * cg], shift=(2 - k) % rows, axis=0)
                acc = acc + tap_m[k] * zk
            return acc                                         # (rows, G*Cout)

        x = x_ref[...]
        for w_ref, gb_ref, s_ref, st_ref in layer_refs:
            # Hidden conv bias intentionally dropped: BN mean-subtraction cancels it exactly.
            y = conv_same(x, w_ref)
            # Training-mode BatchNorm folded into one per-lane scale & shift.
            ysum = jnp.sum(y, axis=0, keepdims=True)           # (1, G*C)   XLU reduce
            y2sum = jnp.sum(y * y, axis=0, keepdims=True)      # (1, G*C)
            red = jnp.dot(jnp.concatenate([ysum, y2sum], axis=0), s_ref[...],
                          preferred_element_type=jnp.float32) * inv_n      # (2, C) group-reduced
            mean = red[0:1, :]
            var = jnp.maximum(red[1:2, :] - mean * mean, 0.0)  # clamp single-pass cancellation
            gb = gb_ref[...]                                   # (2, C): [gamma; beta]
            scale_c = gb[0:1, :] * jax.lax.rsqrt(var + BN_EPS)
            shift_c = gb[1:2, :] - mean * scale_c
            ssw = jnp.dot(jnp.concatenate([scale_c, shift_c], axis=0), st_ref[...],
                          preferred_element_type=jnp.float32)  # (2, G*C) broadcast back to lanes
            x = jnp.maximum(y * ssw[0:1, :] + ssw[1:2, :], 0.0)

        y = conv_same(x, wl_ref) + blast_ref[...]
        y = 5.0 * pl.reciprocal(1.0 + jnp.exp(-y), approx=False)   # 5 * sigmoid (exact)
        out_ref[...] = y * pred_m

    return kernel


def _pick_group(batch, cmax):
    """Largest divisor of batch that is <= 128 // Cmax (keeps BN stats exact: no padded samples)."""
    gmax = max(1, 128 // max(1, cmax))
    g = 1
    for d in range(1, min(batch, gmax) + 1):
        if batch % d == 0:
            g = d
    return g


def init_params(key, nb_features, nb_layer):
    """Deterministic synthetic parameters with the same shapes as the PyTorch module."""
    params = []
    c_in = nb_features
    for _ in range(nb_layer):
        c_out = 2 * c_in
        key, kw, kb = jax.random.split(key, 3)
        w = 0.1 * jax.random.normal(kw, (c_out, c_in, KSIZE), jnp.float32)  # torch (Cout,Cin,K)
        b = 0.1 * jax.random.normal(kb, (c_out,), jnp.float32)
        gamma = jnp.ones((c_out,), jnp.float32)   # BatchNorm1d default init
        beta = jnp.zeros((c_out,), jnp.float32)
        params.append((w, b, gamma, beta))
        c_in = c_out
    key, kw, kb = jax.random.split(key, 3)
    w_last = 0.1 * jax.random.normal(kw, (1, c_in, KSIZE), jnp.float32)
    b_last = 0.1 * jax.random.normal(kb, (1,), jnp.float32)
    return params, (w_last, b_last)


def convnet_forward(yr, doy, era5_hourly, params, last_params, param_dtype=jnp.float32):
    nb_layer = len(params)
    batch = era5_hourly.shape[0]
    c0 = era5_hourly.shape[1] + 2
    cmax = c0 * (2 ** nb_layer)
    gpack = _pick_group(batch, cmax)
    rows = (batch // gpack) * L              # always a multiple of 8 (24 = 8*3)

    # --- glue (plain JAX): replicate doy/yr across 24 hours, concat channels, lane-pack G samples ---
    doy_r = jnp.broadcast_to(doy, (batch, L))[:, None, :]
    yr_r = jnp.broadcast_to(yr, (batch, L))[:, None, :]
    x_ncl = jnp.concatenate([era5_hourly, doy_r, yr_r], axis=1).astype(jnp.float32)  # (B, C0, 24)
    x_blc = jnp.transpose(x_ncl, (0, 2, 1))                                          # (B, 24, C0)
    x_packed = (x_blc.reshape(batch // gpack, gpack, L, c0)
                     .transpose(0, 2, 1, 3)
                     .reshape(rows, gpack * c0))                                     # (rows, G*C0)

    # --- per-row masks (hour index only): 5 tap-validity masks + prediction-hour mask ---
    t = jnp.tile(jnp.arange(L, dtype=jnp.int32), rows // L)
    cols = [((t + (k - 2) >= 0) & (t + (k - 2) < L)) for k in range(KSIZE)]
    cols.append((t >= 6) & (t < 21))
    masks = jnp.stack(cols, axis=1).astype(jnp.float32)                              # (rows, 6)

    eye_g = jnp.eye(gpack, dtype=jnp.float32)
    inputs = [x_packed, masks]
    for (w, b, gamma, beta) in params:                 # conv bias b dropped (BN cancels it exactly)
        cout, cin, _ = w.shape
        w_tck = jnp.transpose(w, (1, 2, 0))            # (Cin, K, Cout)
        # Block-diagonal over lane groups, taps stacked tap-major along output columns.
        w_wide = jnp.concatenate([jnp.kron(eye_g, w_tck[:, k, :]) for k in range(KSIZE)], axis=1)
        inputs.append(w_wide.astype(param_dtype))                                    # (G*Cin, 5*G*Cout)
        inputs.append(jnp.stack([gamma, beta], axis=0).astype(jnp.float32))          # (2, Cout)
        s_mat = jnp.tile(jnp.eye(cout, dtype=jnp.float32), (gpack, 1))               # (G*Cout, Cout)
        inputs.append(s_mat)
        inputs.append(s_mat.T)                                                       # (Cout, G*Cout)
    w_last, b_last = last_params
    wl_tck = jnp.transpose(w_last, (1, 2, 0))          # (Cf, K, 1)
    wl_wide = jnp.concatenate([jnp.kron(eye_g, wl_tck[:, k, :]) for k in range(KSIZE)], axis=1)
    inputs.append(wl_wide.astype(param_dtype))                                       # (G*Cf, 5*G)
    inputs.append(b_last.reshape(1, 1).astype(jnp.float32))

    # --- VMEM budget derived from the working set, capped by the chip's capacity ---
    widest = gpack * cmax
    est = 4 * rows * (gpack * c0 + 6 + gpack)                # packed input + masks + output
    est += 3 * 4 * rows * widest * (KSIZE + 2)               # widest z / y / x live values + headroom
    est += sum(int(a.size) * 4 for a in inputs[2:]) + (2 << 20)
    try:
        cap = int(0.85 * pltpu.get_tpu_info().vmem_capacity_bytes)
    except Exception:
        cap = 48 * 1024 * 1024
    vmem_limit = int(min(max(32 * 1024 * 1024, est), cap))

    vmem = pl.BlockSpec(memory_space=pltpu.MemorySpace.VMEM)
    out = pl.pallas_call(
        _make_kernel(nb_layer, rows, gpack),
        out_shape=jax.ShapeDtypeStruct((rows, gpack), jnp.float32),
        in_specs=[vmem] * len(inputs),
        out_specs=vmem,
        compiler_params=pltpu.CompilerParams(vmem_limit_bytes=vmem_limit),
    )(*inputs)

    # Unpack lanes back to (B, 1, 24) like PyTorch.
    out = out.reshape(batch // gpack, L, gpack).transpose(0, 2, 1).reshape(batch, L)
    return out[:, None, :]


def convnet_reference(yr, doy, era5_hourly, params, last_params):
    """Pure-JAX reference (keeps the hidden conv biases; BN cancels them, matching the kernel)."""
    batch = era5_hourly.shape[0]
    doy_r = jnp.broadcast_to(doy, (batch, L))[:, None, :]
    yr_r = jnp.broadcast_to(yr, (batch, L))[:, None, :]
    x = jnp.concatenate([era5_hourly, doy_r, yr_r], axis=1)        # (B, C, L)

    def conv1d(x, w, b):
        y = jax.lax.conv_general_dilated(
            x, w, window_strides=(1,), padding=[(2, 2)],
            dimension_numbers=("NCH", "OIH", "NCH"))
        return y + b[None, :, None]

    for (w, b, gamma, beta) in params:
        y = conv1d(x, w, b)
        mean = jnp.mean(y, axis=(0, 2), keepdims=True)
        var = jnp.mean((y - mean) ** 2, axis=(0, 2), keepdims=True)
        y = (y - mean) / jnp.sqrt(var + BN_EPS) * gamma[None, :, None] + beta[None, :, None]
        x = jnp.maximum(y, 0.0)
    w_last, b_last = last_params
    y = 5.0 * jax.nn.sigmoid(conv1d(x, w_last, b_last))
    pm = jnp.ones((L,), jnp.float32).at[:6].set(0.0).at[21:].set(0.0)
    return y * pm[None, None, :]


if __name__ == "__main__":
    nb_features, nb_layer, batch = 4, 2, 2
    key = jax.random.PRNGKey(0)
    kp, k1, k2, k3 = jax.random.split(key, 4)
    params, last_params = init_params(kp, nb_features, nb_layer)

    era5_hourly = jax.random.normal(k1, (batch, nb_features - 2, L), jnp.float32)
    doy = jax.random.uniform(k2, (batch, 1), jnp.float32)
    yr = jax.random.uniform(k3, (batch, 1), jnp.float32)

    out = convnet_forward(yr, doy, era5_hourly, params, last_params)
    out = jax.block_until_ready(out)
    assert out.shape == (batch, 1, L)

    ref = convnet_reference(yr, doy, era5_hourly, params, last_params)
    import numpy as np
    np.testing.assert_allclose(np.asarray(out), np.asarray(ref), rtol=2e-4, atol=1e-5)
    print("KERNEL_OK")
</pallas_src>

<mosaic_0001>
module attributes {stable_mosaic.version = 11 : i64} {
  func.func @kernel(%arg0: memref<24x8xf32, #tpu.memory_space<vmem>>, %arg1: memref<24x6xf32, #tpu.memory_space<vmem>>, %arg2: memref<8x80xf32, #tpu.memory_space<vmem>>, %arg3: memref<2x8xf32, #tpu.memory_space<vmem>>, %arg4: memref<16x8xf32, #tpu.memory_space<vmem>>, %arg5: memref<8x16xf32, #tpu.memory_space<vmem>>, %arg6: memref<16x160xf32, #tpu.memory_space<vmem>>, %arg7: memref<2x16xf32, #tpu.memory_space<vmem>>, %arg8: memref<32x16xf32, #tpu.memory_space<vmem>>, %arg9: memref<16x32xf32, #tpu.memory_space<vmem>>, %arg10: memref<32x10xf32, #tpu.memory_space<vmem>>, %arg11: memref<1x1xf32, #tpu.memory_space<vmem>>, %arg12: memref<24x2xf32, #tpu.memory_space<vmem>>) attributes {dimension_semantics = [], scalar_prefetch = 0 : i64, scratch_operands = 0 : i64, tpu.core_type = #tpu.core_type<tc>} {
    %c0 = arith.constant 0 : index
    %c0_0 = arith.constant 0 : index
    %0 = vector.load %arg1[%c0, %c0_0] : memref<24x6xf32, #tpu.memory_space<vmem>>, vector<24x6xf32>
    %1 = vector.extract_strided_slice %0 {offsets = [0, 0], sizes = [24, 1], strides = [1, 1]} : vector<24x6xf32> to vector<24x1xf32>
    %2 = vector.extract_strided_slice %0 {offsets = [0, 1], sizes = [24, 1], strides = [1, 1]} : vector<24x6xf32> to vector<24x1xf32>
    %3 = vector.extract_strided_slice %0 {offsets = [0, 3], sizes = [24, 1], strides = [1, 1]} : vector<24x6xf32> to vector<24x1xf32>
    %4 = vector.extract_strided_slice %0 {offsets = [0, 4], sizes = [24, 1], strides = [1, 1]} : vector<24x6xf32> to vector<24x1xf32>
    %5 = vector.extract_strided_slice %0 {offsets = [0, 5], sizes = [24, 1], strides = [1, 1]} : vector<24x6xf32> to vector<24x1xf32>
    %c0_1 = arith.constant 0 : index
    %c0_2 = arith.constant 0 : index
    %6 = vector.load %arg0[%c0_1, %c0_2] : memref<24x8xf32, #tpu.memory_space<vmem>>, vector<24x8xf32>
    %c0_3 = arith.constant 0 : index
    %c0_4 = arith.constant 0 : index
    %7 = vector.load %arg2[%c0_3, %c0_4] : memref<8x80xf32, #tpu.memory_space<vmem>>, vector<8x80xf32>
    %cst = arith.constant dense<0.000000e+00> : vector<24x80xf32>
    %8 = tpu.matmul %6, %7, %cst {dimension_numbers = #tpu.dot_dimension_numbers<[1], [0], [0], [1], [0, 0, 1, 1], [], []>} : vector<24x8xf32>, vector<8x80xf32>, vector<24x80xf32> -> vector<24x80xf32>
    %9 = vector.extract_strided_slice %8 {offsets = [0, 32], sizes = [24, 16], strides = [1, 1]} : vector<24x80xf32> to vector<24x16xf32>
    %10 = vector.extract_strided_slice %8 {offsets = [0, 0], sizes = [24, 16], strides = [1, 1]} : vector<24x80xf32> to vector<24x16xf32>
    %c2_i32 = arith.constant 2 : i32
    %11 = tpu.dynamic_rotate %10 by %c2_i32 dim 0 : vector<24x16xf32>, i32 -> vector<24x16xf32>
    %12 = vector.broadcast %1 : vector<24x1xf32> to vector<24x16xf32>
    %13 = arith.mulf %12, %11 : vector<24x16xf32>
    %14 = arith.addf %9, %13 : vector<24x16xf32>
    %15 = vector.extract_strided_slice %8 {offsets = [0, 16], sizes = [24, 16], strides = [1, 1]} : vector<24x80xf32> to vector<24x16xf32>
    %c1_i32 = arith.constant 1 : i32
    %16 = tpu.dynamic_rotate %15 by %c1_i32 dim 0 : vector<24x16xf32>, i32 -> vector<24x16xf32>
    %17 = vector.broadcast %2 : vector<24x1xf32> to vector<24x16xf32>
    %18 = arith.mulf %17, %16 : vector<24x16xf32>
    %19 = arith.addf %14, %18 : vector<24x16xf32>
    %20 = vector.extract_strided_slice %8 {offsets = [0, 48], sizes = [24, 16], strides = [1, 1]} : vector<24x80xf32> to vector<24x16xf32>
    %c23_i32 = arith.constant 23 : i32
    %21 = tpu.dynamic_rotate %20 by %c23_i32 dim 0 : vector<24x16xf32>, i32 -> vector<24x16xf32>
    %22 = vector.broadcast %3 : vector<24x1xf32> to vector<24x16xf32>
    %23 = arith.mulf %22, %21 : vector<24x16xf32>
    %24 = arith.addf %19, %23 : vector<24x16xf32>
    %25 = vector.extract_strided_slice %8 {offsets = [0, 64], sizes = [24, 16], strides = [1, 1]} : vector<24x80xf32> to vector<24x16xf32>
    %c22_i32 = arith.constant 22 : i32
    %26 = tpu.dynamic_rotate %25 by %c22_i32 dim 0 : vector<24x16xf32>, i32 -> vector<24x16xf32>
    %27 = vector.broadcast %4 : vector<24x1xf32> to vector<24x16xf32>
    %28 = arith.mulf %27, %26 : vector<24x16xf32>
    %29 = arith.addf %24, %28 : vector<24x16xf32>
    %cst_5 = arith.constant dense<0.000000e+00> : vector<16xf32>
    %30 = vector.multi_reduction <add>, %29, %cst_5 [0] : vector<24x16xf32> to vector<16xf32>
    %31 = vector.shape_cast %30 : vector<16xf32> to vector<1x16xf32>
    %32 = arith.mulf %29, %29 : vector<24x16xf32>
    %cst_6 = arith.constant dense<0.000000e+00> : vector<16xf32>
    %33 = vector.multi_reduction <add>, %32, %cst_6 [0] : vector<24x16xf32> to vector<16xf32>
    %34 = vector.shape_cast %33 : vector<16xf32> to vector<1x16xf32>
    %35 = tpu.concatenate %31, %34 in 0 : vector<1x16xf32>, vector<1x16xf32> -> vector<2x16xf32>
    %c0_7 = arith.constant 0 : index
    %c0_8 = arith.constant 0 : index
    %36 = vector.load %arg4[%c0_7, %c0_8] : memref<16x8xf32, #tpu.memory_space<vmem>>, vector<16x8xf32>
    %cst_9 = arith.constant dense<0.000000e+00> : vector<2x8xf32>
    %37 = tpu.matmul %35, %36, %cst_9 {dimension_numbers = #tpu.dot_dimension_numbers<[1], [0], [0], [1], [0, 0, 1, 1], [], []>} : vector<2x16xf32>, vector<16x8xf32>, vector<2x8xf32> -> vector<2x8xf32>
    %cst_10 = arith.constant 0.020833334 : f32
    %38 = vector.broadcast %cst_10 : f32 to vector<2x8xf32>
    %39 = arith.mulf %37, %38 : vector<2x8xf32>
    %40 = vector.extract_strided_slice %39 {offsets = [0, 0], sizes = [1, 8], strides = [1, 1]} : vector<2x8xf32> to vector<1x8xf32>
    %41 = vector.extract_strided_slice %39 {offsets = [1, 0], sizes = [1, 8], strides = [1, 1]} : vector<2x8xf32> to vector<1x8xf32>
    %42 = arith.mulf %40, %40 : vector<1x8xf32>
    %43 = arith.subf %41, %42 : vector<1x8xf32>
    %cst_11 = arith.constant 0.000000e+00 : f32
    %44 = vector.broadcast %cst_11 : f32 to vector<1x8xf32>
    %45 = arith.maximumf %43, %44 : vector<1x8xf32>
    %c0_12 = arith.constant 0 : index
    %c0_13 = arith.constant 0 : index
    %46 = vector.load %arg3[%c0_12, %c0_13] : memref<2x8xf32, #tpu.memory_space<vmem>>, vector<2x8xf32>
    %47 = vector.extract_strided_slice %46 {offsets = [0, 0], sizes = [1, 8], strides = [1, 1]} : vector<2x8xf32> to vector<1x8xf32>
    %cst_14 = arith.constant 9.99999974E-6 : f32
    %48 = vector.broadcast %cst_14 : f32 to vector<1x8xf32>
    %49 = arith.addf %45, %48 : vector<1x8xf32>
    %50 = math.rsqrt %49 : vector<1x8xf32>
    %51 = arith.mulf %47, %50 : vector<1x8xf32>
    %52 = vector.extract_strided_slice %46 {offsets = [1, 0], sizes = [1, 8], strides = [1, 1]} : vector<2x8xf32> to vector<1x8xf32>
    %53 = arith.mulf %40, %51 : vector<1x8xf32>
    %54 = arith.subf %52, %53 : vector<1x8xf32>
    %55 = tpu.concatenate %51, %54 in 0 : vector<1x8xf32>, vector<1x8xf32> -> vector<2x8xf32>
    %c0_15 = arith.constant 0 : index
    %c0_16 = arith.constant 0 : index
    %56 = vector.load %arg5[%c0_15, %c0_16] : memref<8x16xf32, #tpu.memory_space<vmem>>, vector<8x16xf32>
    %cst_17 = arith.constant dense<0.000000e+00> : vector<2x16xf32>
    %57 = tpu.matmul %55, %56, %cst_17 {dimension_numbers = #tpu.dot_dimension_numbers<[1], [0], [0], [1], [0, 0, 1, 1], [], []>} : vector<2x8xf32>, vector<8x16xf32>, vector<2x16xf32> -> vector<2x16xf32>
    %58 = vector.extract_strided_slice %57 {offsets = [0, 0], sizes = [1, 16], strides = [1, 1]} : vector<2x16xf32> to vector<1x16xf32>
    %59 = vector.broadcast %58 : vector<1x16xf32> to vector<24x16xf32>
    %60 = arith.mulf %29, %59 : vector<24x16xf32>
    %61 = vector.extract_strided_slice %57 {offsets = [1, 0], sizes = [1, 16], strides = [1, 1]} : vector<2x16xf32> to vector<1x16xf32>
    %62 = vector.broadcast %61 : vector<1x16xf32> to vector<24x16xf32>
    %63 = arith.addf %60, %62 : vector<24x16xf32>
    %cst_18 = arith.constant 0.000000e+00 : f32
    %64 = vector.broadcast %cst_18 : f32 to vector<24x16xf32>
    %65 = arith.maximumf %63, %64 : vector<24x16xf32>
    %c0_19 = arith.constant 0 : index
    %c0_20 = arith.constant 0 : index
    %66 = vector.load %arg6[%c0_19, %c0_20] : memref<16x160xf32, #tpu.memory_space<vmem>>, vector<16x160xf32>
    %cst_21 = arith.constant dense<0.000000e+00> : vector<24x160xf32>
    %67 = tpu.matmul %65, %66, %cst_21 {dimension_numbers = #tpu.dot_dimension_numbers<[1], [0], [0], [1], [0, 0, 1, 1], [], []>} : vector<24x16xf32>, vector<16x160xf32>, vector<24x160xf32> -> vector<24x160xf32>
    %68 = vector.extract_strided_slice %67 {offsets = [0, 64], sizes = [24, 32], strides = [1, 1]} : vector<24x160xf32> to vector<24x32xf32>
    %69 = vector.extract_strided_slice %67 {offsets = [0, 0], sizes = [24, 32], strides = [1, 1]} : vector<24x160xf32> to vector<24x32xf32>
    %c2_i32_22 = arith.constant 2 : i32
    %70 = tpu.dynamic_rotate %69 by %c2_i32_22 dim 0 : vector<24x32xf32>, i32 -> vector<24x32xf32>
    %71 = vector.broadcast %1 : vector<24x1xf32> to vector<24x32xf32>
    %72 = arith.mulf %71, %70 : vector<24x32xf32>
    %73 = arith.addf %68, %72 : vector<24x32xf32>
    %74 = vector.extract_strided_slice %67 {offsets = [0, 32], sizes = [24, 32], strides = [1, 1]} : vector<24x160xf32> to vector<24x32xf32>
    %c1_i32_23 = arith.constant 1 : i32
    %75 = tpu.dynamic_rotate %74 by %c1_i32_23 dim 0 : vector<24x32xf32>, i32 -> vector<24x32xf32>
    %76 = vector.broadcast %2 : vector<24x1xf32> to vector<24x32xf32>
    %77 = arith.mulf %76, %75 : vector<24x32xf32>
    %78 = arith.addf %73, %77 : vector<24x32xf32>
    %79 = vector.extract_strided_slice %67 {offsets = [0, 96], sizes = [24, 32], strides = [1, 1]} : vector<24x160xf32> to vector<24x32xf32>
    %c23_i32_24 = arith.constant 23 : i32
    %80 = tpu.dynamic_rotate %79 by %c23_i32_24 dim 0 : vector<24x32xf32>, i32 -> vector<24x32xf32>
    %81 = vector.broadcast %3 : vector<24x1xf32> to vector<24x32xf32>
    %82 = arith.mulf %81, %80 : vector<24x32xf32>
    %83 = arith.addf %78, %82 : vector<24x32xf32>
    %84 = vector.extract_strided_slice %67 {offsets = [0, 128], sizes = [24, 32], strides = [1, 1]} : vector<24x160xf32> to vector<24x32xf32>
    %c22_i32_25 = arith.constant 22 : i32
    %85 = tpu.dynamic_rotate %84 by %c22_i32_25 dim 0 : vector<24x32xf32>, i32 -> vector<24x32xf32>
    %86 = vector.broadcast %4 : vector<24x1xf32> to vector<24x32xf32>
    %87 = arith.mulf %86, %85 : vector<24x32xf32>
    %88 = arith.addf %83, %87 : vector<24x32xf32>
    %cst_26 = arith.constant dense<0.000000e+00> : vector<32xf32>
    %89 = vector.multi_reduction <add>, %88, %cst_26 [0] : vector<24x32xf32> to vector<32xf32>
    %90 = vector.shape_cast %89 : vector<32xf32> to vector<1x32xf32>
    %91 = arith.mulf %88, %88 : vector<24x32xf32>
    %cst_27 = arith.constant dense<0.000000e+00> : vector<32xf32>
    %92 = vector.multi_reduction <add>, %91, %cst_27 [0] : vector<24x32xf32> to vector<32xf32>
    %93 = vector.shape_cast %92 : vector<32xf32> to vector<1x32xf32>
    %94 = tpu.concatenate %90, %93 in 0 : vector<1x32xf32>, vector<1x32xf32> -> vector<2x32xf32>
    %c0_28 = arith.constant 0 : index
    %c0_29 = arith.constant 0 : index
    %95 = vector.load %arg8[%c0_28, %c0_29] : memref<32x16xf32, #tpu.memory_space<vmem>>, vector<32x16xf32>
    %cst_30 = arith.constant dense<0.000000e+00> : vector<2x16xf32>
    %96 = tpu.matmul %94, %95, %cst_30 {dimension_numbers = #tpu.dot_dimension_numbers<[1], [0], [0], [1], [0, 0, 1, 1], [], []>} : vector<2x32xf32>, vector<32x16xf32>, vector<2x16xf32> -> vector<2x16xf32>
    %cst_31 = arith.constant 0.020833334 : f32
    %97 = vector.broadcast %cst_31 : f32 to vector<2x16xf32>
    %98 = arith.mulf %96, %97 : vector<2x16xf32>
    %99 = vector.extract_strided_slice %98 {offsets = [0, 0], sizes = [1, 16], strides = [1, 1]} : vector<2x16xf32> to vector<1x16xf32>
    %100 = vector.extract_strided_slice %98 {offsets = [1, 0], sizes = [1, 16], strides = [1, 1]} : vector<2x16xf32> to vector<1x16xf32>
    %101 = arith.mulf %99, %99 : vector<1x16xf32>
    %102 = arith.subf %100, %101 : vector<1x16xf32>
    %cst_32 = arith.constant 0.000000e+00 : f32
    %103 = vector.broadcast %cst_32 : f32 to vector<1x16xf32>
    %104 = arith.maximumf %102, %103 : vector<1x16xf32>
    %c0_33 = arith.constant 0 : index
    %c0_34 = arith.constant 0 : index
    %105 = vector.load %arg7[%c0_33, %c0_34] : memref<2x16xf32, #tpu.memory_space<vmem>>, vector<2x16xf32>
    %106 = vector.extract_strided_slice %105 {offsets = [0, 0], sizes = [1, 16], strides = [1, 1]} : vector<2x16xf32> to vector<1x16xf32>
    %cst_35 = arith.constant 9.99999974E-6 : f32
    %107 = vector.broadcast %cst_35 : f32 to vector<1x16xf32>
    %108 = arith.addf %104, %107 : vector<1x16xf32>
    %109 = math.rsqrt %108 : vector<1x16xf32>
    %110 = arith.mulf %106, %109 : vector<1x16xf32>
    %111 = vector.extract_strided_slice %105 {offsets = [1, 0], sizes = [1, 16], strides = [1, 1]} : vector<2x16xf32> to vector<1x16xf32>
    %112 = arith.mulf %99, %110 : vector<1x16xf32>
    %113 = arith.subf %111, %112 : vector<1x16xf32>
    %114 = tpu.concatenate %110, %113 in 0 : vector<1x16xf32>, vector<1x16xf32> -> vector<2x16xf32>
    %c0_36 = arith.constant 0 : index
    %c0_37 = arith.constant 0 : index
    %115 = vector.load %arg9[%c0_36, %c0_37] : memref<16x32xf32, #tpu.memory_space<vmem>>, vector<16x32xf32>
    %cst_38 = arith.constant dense<0.000000e+00> : vector<2x32xf32>
    %116 = tpu.matmul %114, %115, %cst_38 {dimension_numbers = #tpu.dot_dimension_numbers<[1], [0], [0], [1], [0, 0, 1, 1], [], []>} : vector<2x16xf32>, vector<16x32xf32>, vector<2x32xf32> -> vector<2x32xf32>
    %117 = vector.extract_strided_slice %116 {offsets = [0, 0], sizes = [1, 32], strides = [1, 1]} : vector<2x32xf32> to vector<1x32xf32>
    %118 = vector.broadcast %117 : vector<1x32xf32> to vector<24x32xf32>
    %119 = arith.mulf %88, %118 : vector<24x32xf32>
    %120 = vector.extract_strided_slice %116 {offsets = [1, 0], sizes = [1, 32], strides = [1, 1]} : vector<2x32xf32> to vector<1x32xf32>
    %121 = vector.broadcast %120 : vector<1x32xf32> to vector<24x32xf32>
    %122 = arith.addf %119, %121 : vector<24x32xf32>
    %cst_39 = arith.constant 0.000000e+00 : f32
    %123 = vector.broadcast %cst_39 : f32 to vector<24x32xf32>
    %124 = arith.maximumf %122, %123 : vector<24x32xf32>
    %c0_40 = arith.constant 0 : index
    %c0_41 = arith.constant 0 : index
    %125 = vector.load %arg10[%c0_40, %c0_41] : memref<32x10xf32, #tpu.memory_space<vmem>>, vector<32x10xf32>
    %cst_42 = arith.constant dense<0.000000e+00> : vector<24x10xf32>
    %126 = tpu.matmul %124, %125, %cst_42 {dimension_numbers = #tpu.dot_dimension_numbers<[1], [0], [0], [1], [0, 0, 1, 1], [], []>} : vector<24x32xf32>, vector<32x10xf32>, vector<24x10xf32> -> vector<24x10xf32>
    %127 = vector.extract_strided_slice %126 {offsets = [0, 4], sizes = [24, 2], strides = [1, 1]} : vector<24x10xf32> to vector<24x2xf32>
    %128 = vector.extract_strided_slice %126 {offsets = [0, 0], sizes = [24, 2], strides = [1, 1]} : vector<24x10xf32> to vector<24x2xf32>
    %c2_i32_43 = arith.constant 2 : i32
    %129 = tpu.dynamic_rotate %128 by %c2_i32_43 dim 0 : vector<24x2xf32>, i32 -> vector<24x2xf32>
    %130 = vector.broadcast %1 : vector<24x1xf32> to vector<24x2xf32>
    %131 = arith.mulf %130, %129 : vector<24x2xf32>
    %132 = arith.addf %127, %131 : vector<24x2xf32>
    %133 = vector.extract_strided_slice %126 {offsets = [0, 2], sizes = [24, 2], strides = [1, 1]} : vector<24x10xf32> to vector<24x2xf32>
    %c1_i32_44 = arith.constant 1 : i32
    %134 = tpu.dynamic_rotate %133 by %c1_i32_44 dim 0 : vector<24x2xf32>, i32 -> vector<24x2xf32>
    %135 = vector.broadcast %2 : vector<24x1xf32> to vector<24x2xf32>
    %136 = arith.mulf %135, %134 : vector<24x2xf32>
    %137 = arith.addf %132, %136 : vector<24x2xf32>
    %138 = vector.extract_strided_slice %126 {offsets = [0, 6], sizes = [24, 2], strides = [1, 1]} : vector<24x10xf32> to vector<24x2xf32>
    %c23_i32_45 = arith.constant 23 : i32
    %139 = tpu.dynamic_rotate %138 by %c23_i32_45 dim 0 : vector<24x2xf32>, i32 -> vector<24x2xf32>
    %140 = vector.broadcast %3 : vector<24x1xf32> to vector<24x2xf32>
    %141 = arith.mulf %140, %139 : vector<24x2xf32>
    %142 = arith.addf %137, %141 : vector<24x2xf32>
    %143 = vector.extract_strided_slice %126 {offsets = [0, 8], sizes = [24, 2], strides = [1, 1]} : vector<24x10xf32> to vector<24x2xf32>
    %c22_i32_46 = arith.constant 22 : i32
    %144 = tpu.dynamic_rotate %143 by %c22_i32_46 dim 0 : vector<24x2xf32>, i32 -> vector<24x2xf32>
    %145 = vector.broadcast %4 : vector<24x1xf32> to vector<24x2xf32>
    %146 = arith.mulf %145, %144 : vector<24x2xf32>
    %147 = arith.addf %142, %146 : vector<24x2xf32>
    %c0_47 = arith.constant 0 : index
    %c0_48 = arith.constant 0 : index
    %148 = vector.load %arg11[%c0_47, %c0_48] : memref<1x1xf32, #tpu.memory_space<vmem>>, vector<1x1xf32>
    %149 = vector.broadcast %148 : vector<1x1xf32> to vector<24x2xf32>
    %150 = arith.addf %147, %149 : vector<24x2xf32>
    %cst_49 = arith.constant 0.000000e+00 : f32
    %151 = vector.broadcast %cst_49 : f32 to vector<24x2xf32>
    %152 = arith.subf %151, %150 : vector<24x2xf32>
    %153 = math.exp %152 : vector<24x2xf32>
    %cst_50 = arith.constant 1.000000e+00 : f32
    %154 = vector.broadcast %cst_50 : f32 to vector<24x2xf32>
    %155 = arith.addf %154, %153 : vector<24x2xf32>
    %156 = tpu.reciprocal %155 : vector<24x2xf32> -> vector<24x2xf32>
    %cst_51 = arith.constant 5.000000e+00 : f32
    %157 = vector.broadcast %cst_51 : f32 to vector<24x2xf32>
    %158 = arith.mulf %157, %156 : vector<24x2xf32>
    %159 = vector.broadcast %5 : vector<24x1xf32> to vector<24x2xf32>
    %160 = arith.mulf %158, %159 : vector<24x2xf32>
    %c0_52 = arith.constant 0 : index
    %c0_53 = arith.constant 0 : index
    %161 = vector.load %arg12[%c0_52, %c0_53] : memref<24x2xf32, #tpu.memory_space<vmem>>, vector<24x2xf32>
    tpu.vector_store %arg12[%c0_52, %c0_53], %160 {strides = array<i32>} : memref<24x2xf32, #tpu.memory_space<vmem>>, vector<24x2xf32>,
    return
  }
}

</mosaic_0001>

<bundles_post_ra>
// kernel: tpu_custom_call.1
= control target key start
LH: loop header
LB: loop body
LE: loop exit
PB: predicated region body
PF: predicated region fallthrough
CT: control target
= control target key end

     0   :  { %vm50_vm0 = vcmask 64512   ;;  %v1054_v3 = vmov 0   ;;  %v1055_v7 = vmov 1   ;;  %v1056_v9 = vmov 3   ;;  %s1058_s15 = smov 80   ;;  %s1059_s16 = smov 112   ;;  %s1556_s2 = inlined_call_operand.vmem [shape: f32[8,80], index: 2, kind: input, shape index: {}]   ;;  %s1557_s0 = inlined_call_operand.vmem [shape: f32[24,8], index: 0, kind: input, shape index: {}]   ;;  %s1558_s1 = inlined_call_operand.vmem [shape: f32[24,6], index: 1, kind: input, shape index: {}]   ;;  %s1559_s4 = inlined_call_operand.vmem [shape: f32[16,8], index: 4, kind: input, shape index: {}]   ;;  %s1560_s5 = inlined_call_operand.vmem [shape: f32[8,16], index: 5, kind: input, shape index: {}]   ;;  %s1561_s3 = inlined_call_operand.vmem [shape: f32[2,8], index: 3, kind: input, shape index: {}]   ;;  %s1562_s6 = inlined_call_operand.vmem [shape: f32[16,160], index: 6, kind: input, shape index: {}]   ;;  %s1563_s8 = inlined_call_operand.vmem [shape: f32[32,16], index: 8, kind: input, shape index: {}]   ;;  %s1564_s9 = inlined_call_operand.vmem [shape: f32[16,32], index: 9, kind: input, shape index: {}]   ;;  %s1565_s7 = inlined_call_operand.vmem [shape: f32[2,16], index: 7, kind: input, shape index: {}]   ;;  %s1566_s10 = inlined_call_operand.vmem [shape: f32[32,10], index: 10, kind: input, shape index: {}]   ;;  %s1567_s11 = inlined_call_operand.<no memory space> [shape: f32[1,1], index: 11, kind: input, shape index: {}]   ;;  %s1568_s12 = inlined_call_operand.vmem [shape: f32[24,2], index: 12, kind: output, shape index: {}]  }
   0x1   :  { %v49_v0 = vld [vmem:[%s1556_s2] sm:$0xff]  ;;  %v47_v2 = vld [vmem:[%s1557_s0 + $0x8] sm:$0xff]  ;;  %1021 = vset.pattern.permute.xlu1 %v1054_v3  ;;  %1022 = vset.pattern.permute.xlu2 %v1054_v3  ;;  %v48_v4 = vld [vmem:[%s1557_s0 + $0x10] sm:$0xff]  ;;  %v1057_v10 = vmov 4   ;;  %s1060_s17 = smov 64   ;;  %v89_v14 = vlaneseq  ;;  %s1061_s18 = smov 32  }
   0x2   :  { %v46_v1 = vld [vmem:[%s1557_s0] sm:$0xff]  ;;  %75 = vmatpush.msra.mxu0 %v49_v0  ;;  %1004 = vmatpush.msra.mxu1 %v49_v0  ;;  %v44_v6 = vld [vmem:[%s1558_s1 + $0x8] sm:$0xff]  ;;  %v45_v8 = vld [vmem:[%s1558_s1 + $0x10] sm:$0xff]  ;;  %vm269_vm5 = vcmask 392448   ;;  %vm295_vm6 = vcmask 1040384   ;;  %vm302_vm7 = vcmask 130048  }
   0x3   :  { %v43_v5 = vld [vmem:[%s1558_s1] sm:$0xff]  ;;  %1005 = vmatpush.msra.mxu3 %v49_v0  ;;  %988 = vmatmul.msk.f32.vlgmr.msra.gmra.mxu0 %vm50_vm0, %v46_v1  ;;  %v1180_v16 = vshrl.u32 %v89_v14, 7  ;;  %vm585_vm11 = vcmask 785920   ;;  %vm619_vm12 = vcmask 261120   ;;  %s1064_s2 = smov 122   ;;  %s1065_s29 = smov 120  }
   0x4   :  { %989 = vmatmul.msk.f32.vlgmr.msra.gmra.mxu1 %vm50_vm0, %v47_v2  ;;  %990 = vmatmul.msk.f32.vlgmr.msra.gmra.mxu3 %vm50_vm0, %v48_v4 }
   0x5   :  { %97 = vperm.xlu1 %1021, %v43_v5   ;;  %102 = vperm.xlu2 %1022, %v44_v6   ;;  %vm91_vm1 = vcmp.lt.s32.totalorder %v1180_v16, 2  ;;  %vm143_vm2 = vcmp.lt.s32.totalorder %v1180_v16, 1  ;;  %vm189_vm3 = vcmp.lt.s32.totalorder %v1180_v16, 7  ;;  %vm235_vm4 = vcmp.lt.s32.totalorder %v1180_v16, 6  ;;  %v1052_v16 = vld [vmem:[%s1558_s1 + $0x8] sm:$0xff] }
   0x6   :  { %1023 = vset.pattern.permute.xlu0 %v1055_v7 }
   0x7   :  { %148 = vperm.xlu0 %1023, %v43_v5  }
   0xd   :  { %107 = vperm.xlu2 %1022, %v45_v8   ;;  %1024 = vset.pattern.permute.xlu1 %v1055_v7 }
   0xe   :  { %152 = vperm.xlu1 %1024, %v44_v6  }
   0xf   :  { %156 = vperm.xlu0 %1023, %v45_v8  }
  0x15   :  { %1026 = vset.pattern.permute.xlu2 %v1056_v9 }
  0x16   :  { %1025 = vset.pattern.permute.xlu1 %v1056_v9  ;;  %198 = vperm.xlu2 %1026, %v44_v6  }
  0x17   :  { %194 = vperm.xlu1 %1025, %v43_v5   ;;  %1027 = vset.pattern.permute.xlu0 %v1056_v9 }
  0x1e   :  { %1029 = vset.pattern.permute.xlu2 %v1057_v10 }
  0x1f   :  { %1028 = vset.pattern.permute.xlu1 %v1057_v10 }
  0x20   :  { %240 = vperm.xlu1 %1028, %v43_v5  }
  0x5f   :  { %v1178_v15 = vpop.permute.xlu2 %102 }
  0x67   :  { %v1192_v23 = vpop.permute.xlu2 %107 }
  0x70   :  { %v1209_v31 = vpop.permute.xlu2 %198 }
  0x77   :  { %v1188_v21 = vpop.permute.xlu1 %97 }
  0x79   :  { %v1207_v30 = vpop.permute.xlu0 %148 }
  0x80   :  { %v1160_v11 = vpop.f32.mrf.mxu0  ;;  %v1203_v28 = vpop.permute.xlu1 %152 }
  0x81   :  { %v1162_v12 = vpop.f32.mrf.mxu1  ;;  %177 = vrot.lane.b32.xlu2 %v1160_v11, %s1058_s15  ;;  %131 = vrot.lane.b32.xlu0 %v1160_v11, %s1059_s16  ;;  %v86_v17 = vrot.slane %v1160_v11, 6  ;;  %v1213_v33 = vpop.permute.xlu0 %156 }
  0x82   :  { %225 = vrot.lane.b32.xlu1 %v1162_v12, %s1060_s17  ;;  %v87_v18 = vrot.slane %v1162_v12, 6 }
  0x84   :  { %v93_v20 = vsel %vm91_vm1, %v86_v17, %v87_v18 }
  0x85   :  { %v111_v25 = vmul.f32 %v1178_v15, %v93_v20 }
  0x87   :  { %v1168_v13 = vpop.f32.mrf.mxu3 }
  0x88   :  { %v88_v19 = vrot.slane %v1168_v13, 6 }
  0x89   :  { %223 = vrot.lane.b32.xlu2 %v1160_v11, %s1060_s17  ;;  %133 = vrot.lane.b32.xlu0 %v1162_v12, %s1059_s16  ;;  %v1205_v29 = vpop.permute.xlu1 %194 }
  0x8a   :  { %135 = vrot.lane.b32.xlu1 %v1168_v13, %s1059_s16  ;;  %v94_v22 = vsel %vm91_vm1, %v88_v19, %v86_v17  ;;  %v92_v24 = vsel %vm91_vm1, %v87_v18, %v88_v19 }
  0x8b   :  { %v110_v26 = vmul.f32 %v1188_v21, %v94_v22  ;;  %v112_v27 = vmul.f32 %v1192_v23, %v92_v24 }
  0x91   :  { %227 = vrot.lane.b32.xlu2 %v1168_v13, %s1060_s17  ;;  %179 = vrot.lane.b32.xlu0 %v1162_v12, %s1058_s15 }
  0x92   :  { %181 = vrot.lane.b32.xlu1 %v1168_v13, %s1058_s15  ;;  %v1211_v32 = vpop.permute.xlu1 %240 }
  0x99   :  { %244 = vperm.xlu2 %1029, %v44_v6   ;;  %202 = vperm.xlu0 %1027, %v45_v8  }
  0x9a   :  { %248 = vperm.xlu1 %1028, %v45_v8  }
  0xa1   :  { %116 = vrot.lane.b32.xlu2 %v110_v26, %s1061_s18  ;;  %118 = vrot.lane.b32.xlu0 %v111_v25, %s1061_s18  ;;  %v298_v26 = vld [vmem:[%s1559_s4 + $0x8] sm:$0xff] }
  0xa2   :  { %120 = vrot.lane.b32.xlu1 %v112_v27, %s1061_s18  ;;  %1030 = vset.pattern.permute.xlu2 %v1054_v3  ;;  %v297_v27 = vld [vmem:[%s1559_s4] sm:$0xff]  ;;  %s1062_s4 = smov 96  }
  0xa3   :  { %319 = vmatpush.msrb.mxu1 %v298_v26 }
  0xa5   :  { %320 = vmatpush.msrb.mxu1 %v297_v27 }
  0xdb   :  { %v178_v34 = vpop.permute.xlu2 %177 }
  0xdc   :  { %v186_v48 = vrot.slane %v178_v34, 1 }
  0xe3   :  { %v224_v37 = vpop.permute.xlu2 %223 }
  0xe4   :  { %v232_v3 = vrot.slane %v224_v37, 2 }
  0xeb   :  { %v228_v51 = vpop.permute.xlu2 %227 }
  0xec   :  { %v234_v58 = vrot.slane %v228_v51, 2 }
  0xee   :  { %v238_v5 = vsel %vm235_vm4, %v234_v58, %v232_v3 }
  0xf3   :  { %v132_v35 = vpop.permute.xlu0 %131  ;;  %v1244_v0 = vpop.permute.xlu2 %244 }
  0xf4   :  { %v226_v36 = vpop.permute.xlu1 %225  ;;  %v140_v39 = vrot.slane %v132_v35, 7 }
  0xf5   :  { %v233_v57 = vrot.slane %v226_v36, 2 }
  0xf7   :  { %v236_v63 = vsel %vm235_vm4, %v233_v57, %v234_v58  ;;  %v237_v7 = vsel %vm235_vm4, %v232_v3, %v233_v57 }
  0xf8   :  { %v252_v2 = vmul.f32 %v1244_v0, %v236_v63  ;;  %v251_v8 = vmul.f32 %v1211_v32, %v237_v7 }
  0xfb   :  { %v134_v38 = vpop.permute.xlu0 %133  ;;  %v117_v9 = vpop.permute.xlu2 %116 }
  0xfc   :  { %v136_v40 = vpop.permute.xlu1 %135  ;;  %v141_v41 = vrot.slane %v134_v38, 7  ;;  %v125_v22 = vadd.f32 %v117_v9, %v1160_v11 }
  0xfd   :  { %v142_v42 = vrot.slane %v136_v40, 7 }
  0xfe   :  { %v145_v43 = vsel %vm143_vm2, %v140_v39, %v141_v41 }
  0xff   :  { %v144_v44 = vsel %vm143_vm2, %v141_v41, %v142_v42  ;;  %v160_v45 = vmul.f32 %v1203_v28, %v145_v43  ;;  %v146_v62 = vsel %vm143_vm2, %v142_v42, %v140_v39 }
 0x100   :  { %v161_v46 = vmul.f32 %v1213_v33, %v144_v44  ;;  %v159_v1 = vmul.f32 %v1207_v30, %v146_v62 }
 0x101   :  { %167 = vrot.lane.b32.xlu0 %v160_v45, %s1061_s18 }
 0x102   :  { %169 = vrot.lane.b32.xlu1 %v161_v46, %s1061_s18 }
 0x103   :  { %v180_v47 = vpop.permute.xlu0 %179 }
 0x104   :  { %v182_v49 = vpop.permute.xlu1 %181  ;;  %v187_v50 = vrot.slane %v180_v47, 1 }
 0x105   :  { %v188_v52 = vrot.slane %v182_v49, 1 }
 0x106   :  { %v191_v53 = vsel %vm189_vm3, %v186_v48, %v187_v50 }
 0x107   :  { %v205_v54 = vmul.f32 %v1205_v29, %v191_v53  ;;  %v190_v55 = vsel %vm189_vm3, %v187_v50, %v188_v52  ;;  %v192_v59 = vsel %vm189_vm3, %v188_v52, %v186_v48 }
 0x108   :  { %v206_v56 = vmul.f32 %v1209_v31, %v190_v55 }
 0x109   :  { %211 = vrot.lane.b32.xlu2 %v205_v54, %s1061_s18 }
 0x10a   :  { %213 = vrot.lane.b32.xlu0 %v206_v56, %s1061_s18 }
 0x10b   :  { %v1235_v60 = vpop.permute.xlu0 %202 }
 0x10c   :  { %v207_v61 = vmul.f32 %v1235_v60, %v192_v59  ;;  %v1248_v4 = vpop.permute.xlu1 %248 }
 0x10d   :  { %v253_v6 = vmul.f32 %v1248_v4, %v238_v5 }
 0x10e   :  { %215 = vrot.lane.b32.xlu1 %v207_v61, %s1061_s18 }
 0x111   :  { %165 = vrot.lane.b32.xlu2 %v159_v1, %s1061_s18 }
 0x112   :  { %259 = vrot.lane.b32.xlu0 %v252_v2, %s1061_s18 }
 0x113   :  { %v119_v10 = vpop.permute.xlu0 %118 }
 0x114   :  { %v121_v17 = vpop.permute.xlu1 %120  ;;  %v126_v34 = vadd.f32 %v119_v10, %v1162_v12 }
 0x115   :  { %v127_v11 = vadd.f32 %v121_v17, %v1168_v13 }
 0x116   :  { %261 = vrot.lane.b32.xlu1 %v253_v6, %s1061_s18 }
 0x119   :  { %257 = vrot.lane.b32.xlu2 %v251_v8, %s1061_s18 }
 0x163   :  { %v212_v14 = vpop.permute.xlu2 %211 }
 0x16b   :  { %v166_v19 = vpop.permute.xlu2 %165 }
 0x16c   :  { %v174_v25 = vadd.f32 %v166_v19, %v125_v22 }
 0x16e   :  { %v220_v37 = vadd.f32 %v212_v14, %v174_v25 }
 0x173   :  { %v168_v18 = vpop.permute.xlu0 %167  ;;  %v258_v35 = vpop.permute.xlu2 %257 }
 0x174   :  { %v170_v20 = vpop.permute.xlu1 %169  ;;  %v175_v38 = vadd.f32 %v168_v18, %v126_v34  ;;  %v1269_v39 = vadd.f32 %v258_v35, %v220_v37 }
 0x175   :  { %v176_v42 = vadd.f32 %v170_v20, %v127_v11  ;;  %v354_v20 = vld [vmem:[%s1560_s5] sm:$0xff] }
 0x176   :  { %v281_v44 = vmul.f32 %v1269_v39, %v1269_v39  ;;  %v270_v13 = vsel %vm269_vm5, %v1269_v39, 0.0  ;;  %373 = vmatpush.msra.mxu2 %v354_v20 }
 0x178   :  { %v284_v51 = vsel %vm269_vm5, %v281_v44, 0.0 }
 0x17c   :  { %v214_v24 = vpop.permute.xlu0 %213 }
 0x17d   :  { %v221_v40 = vadd.f32 %v214_v24, %v175_v38  ;;  %v332_v38 = vld [vmem:[%s1561_s3] sm:$0x3] }
 0x180   :  { %v216_v36 = vpop.permute.xlu1 %215 }
 0x181   :  { %v222_v45 = vadd.f32 %v216_v36, %v176_v42 }
 0x184   :  { %v260_v41 = vpop.permute.xlu0 %259 }
 0x185   :  { %v1271_v43 = vadd.f32 %v260_v41, %v221_v40 }
 0x187   :  { %v271_v12 = vsel %vm269_vm5, %v1271_v43, 0.0  ;;  %v282_v46 = vmul.f32 %v1271_v43, %v1271_v43 }
 0x188   :  { %v262_v47 = vpop.permute.xlu1 %261  ;;  %v272_v50 = vadd.f32 %v271_v12, %v270_v13 }
 0x189   :  { %v285_v48 = vsel %vm269_vm5, %v282_v46, 0.0  ;;  %v1279_v49 = vadd.f32 %v262_v47, %v222_v45 }
 0x18a   :  { %v286_v54 = vadd.f32 %v285_v48, %v284_v51  ;;  %v399_v48 = vld [vmem:[%s1562_s6 + $0x10] sm:$0xff]  ;;  %v397_v51 = vld [vmem:[%s1562_s6] sm:$0xff] }
 0x18b   :  { %v273_v52 = vsel %vm269_vm5, %v1279_v49, 0.0  ;;  %v283_v53 = vmul.f32 %v1279_v49, %v1279_v49  ;;  %430 = vmatpush.msrb.mxu3 %v399_v48 }
 0x18c   :  { %v274_v55 = vadd.f32 %v273_v52, %v272_v50  ;;  %v400_v50 = vld [vmem:[%s1562_s6 + $0x18] sm:$0xff]  ;;  %v398_v52 = vld [vmem:[%s1562_s6 + $0x8] sm:$0xff] }
 0x18d   :  { %v287_v56 = vsel %vm269_vm5, %v283_v53, 0.0  ;;  %456 = vmatpush.msrb.mxu2 %v400_v50  ;;  %431 = vmatpush.msrb.mxu3 %v397_v51 }
 0x18e   :  { %v275_v57 = vrot.slane %v274_v55, 4  ;;  %v288_v58 = vadd.f32 %v287_v56, %v286_v54 }
 0x18f   :  { %457 = vmatpush.msrb.mxu2 %v398_v52 }
 0x190   :  { %v276_v59 = vadd.f32 %v275_v57, %v274_v55  ;;  %v289_v61 = vrot.slane %v288_v58, 4 }
 0x192   :  { %v277_v62 = vrot.slane %v276_v59, 2  ;;  %v290_v63 = vadd.f32 %v289_v61, %v288_v58 }
 0x194   :  { %v278_v1 = vadd.f32 %v277_v62, %v276_v59  ;;  %v291_v2 = vrot.slane %v290_v63, 2 }
 0x196   :  { %v279_v3 = vrot.slane %v278_v1, 1  ;;  %v292_v5 = vadd.f32 %v291_v2, %v290_v63 }
 0x198   :  { %v293_v6 = vrot.slane %v292_v5, 1  ;;  %v280_v7 = vadd.f32 %v279_v3, %v278_v1 }
 0x19a   :  { %v294_v8 = vadd.f32 %v293_v6, %v292_v5 }
 0x19c   :  { %v296_v9 = vsel %vm295_vm6, %v280_v7, %v294_v8 }
 0x19d   :  { %300 = vrot.lane.b32.xlu2 %v296_v9, %s1062_s4 }
 0x1f7   :  { %v301_v10 = vpop.permute.xlu2 %300 }
 0x1f8   :  { %991 = vmatmul.msk.f32.vlgmr.msrb.gmra.mxu1 %vm302_vm7, %v301_v10 }
 0x275   :  { %v322_v14 = vpop.f32.mrf.mxu1 }
 0x276   :  { %v325_v17 = vmul.f32 0.020833334, %v322_v14 }
 0x278   :  { %v326_v18 = vmul.f32 %v325_v17, %v325_v17 }
 0x27a   :  { %v328_v19 = vrot.slane %v326_v18, 7 }
 0x27c   :  { %v330_v22 = vsub.f32 %v325_v17, %v328_v19 }
 0x27e   :  { %v331_v24 = vmax.f32 %v330_v22, 0.0 }
 0x280   :  { %v333_v25 = vadd.f32 1e-05, %v331_v24 }
 0x282   :  { %1035 = vrsqrt.f32 %v333_v25  ;;  %vm340_vm9 = vweird.f32 %v333_v25 }
 0x288   :  { %v1036_v26 = vpop.eup %1035 }
 0x289   :  { %v335_v27 = vmul.f32 %v1036_v26, %v333_v25  ;;  %vm341_vm8 = vweird.f32 %v1036_v26 }
 0x28a   :  { %vm342_vm10 = vmor %vm340_vm9, %vm341_vm8 }
 0x28b   :  { %v336_v34 = vmul.f32 %v1036_v26, %v335_v27 }
 0x28d   :  { %v337_v35 = vmul.f32 0.5, %v336_v34 }
 0x28f   :  { %v338_v36 = vsub.f32 1.5, %v337_v35 }
 0x291   :  { %v339_v37 = vmul.f32 %v1036_v26, %v338_v36 }
 0x293   :  { %v343_v11 = vsel %vm342_vm10, %v1036_v26, %v339_v37 }
 0x294   :  { %v345_v40 = vrot.slane %v343_v11, 1 }
 0x296   :  { %v347_v41 = vmul.f32 %v345_v40, %v332_v38 }
 0x298   :  { %v348_v42 = vmul.f32 %v347_v41, %v325_v17 }
 0x29a   :  { %v350_v44 = vrot.slane %v348_v42, 7 }
 0x29c   :  { %v352_v45 = vsub.f32 %v332_v38, %v350_v44 }
 0x29e   :  { %v353_v12 = vsel %vm295_vm6, %v347_v41, %v352_v45 }
 0x29f   :  { %992 = vmatmul.msk.f32.vlgmr.msra.gmra.mxu2 %vm50_vm0, %v353_v12 }
 0x322   :  { %v375_v46 = vpop.f32.mrf.mxu2 }
 0x323   :  { %v378_v47 = vperm.slane %v375_v46, 0  ;;  %v386_v13 = vperm.slane %v375_v46, 1 }
 0x325   :  { %388 = vrot.lane.b32.xlu1 %v386_v13, %s1061_s18  ;;  %380 = vrot.lane.b32.xlu0 %v378_v47, %s1061_s18 }
 0x397   :  { %v381_v53 = vpop.permute.xlu0 %380  ;;  %v389_v57 = vpop.permute.xlu1 %388 }
 0x398   :  { %v383_v54 = vmul.f32 %v381_v53, %v1269_v39  ;;  %v384_v55 = vmul.f32 %v381_v53, %v1271_v43  ;;  %v385_v56 = vmul.f32 %v381_v53, %v1279_v49 }
 0x39a   :  { %v393_v58 = vadd.f32 %v389_v57, %v385_v56  ;;  %v392_v59 = vadd.f32 %v389_v57, %v384_v55  ;;  %v391_v61 = vadd.f32 %v389_v57, %v383_v54 }
 0x39c   :  { %v396_v62 = vmax.f32 %v393_v58, 0.0  ;;  %v395_v63 = vmax.f32 %v392_v59, 0.0  ;;  %v394_v1 = vmax.f32 %v391_v61, 0.0 }
 0x39e   :  { %408 = vrot.lane.b32.xlu1 %v396_v62, %s1062_s4  ;;  %406 = vrot.lane.b32.xlu0 %v395_v63, %s1062_s4 }
 0x39f   :  { %404 = vrot.lane.b32.xlu2 %v394_v1, %s1062_s4 }
 0x3f9   :  { %v405_v2 = vpop.permute.xlu2 %404 }
 0x3fa   :  { %993 = vmatmul.msk.f32.vlgmr.msrb.gmra.mxu3 %vm302_vm7, %v405_v2  ;;  %996 = vmatmul.msk.f32.vlgmr.msrb.gmra.mxu2 %vm302_vm7, %v405_v2 }
 0x410   :  { %v407_v39 = vpop.permute.xlu0 %406  ;;  %v409_v43 = vpop.permute.xlu1 %408 }
 0x411   :  { %994 = vmatmul.msk.f32.gmra.mxu3 %vm302_vm7, %v407_v39  ;;  %997 = vmatmul.msk.f32.gmra.mxu2 %vm302_vm7, %v407_v39 }
 0x419   :  { %995 = vmatmul.msk.f32.gmra.mxu3 %vm302_vm7, %v409_v43  ;;  %998 = vmatmul.msk.f32.gmra.mxu2 %vm302_vm7, %v409_v43 }
 0x47d   :  { %v1321_v49 = vpop.f32.mrf.mxu3  ;;  %v459_v22 = vpop.f32.mrf.mxu2 }
 0x47e   :  { %495 = vrot.lane.b32.xlu2 %v1321_v49, %s1062_s4  ;;  %v468_v7 = vrot.slane %v1321_v49, 6  ;;  %v561_v57 = vrot.slane %v459_v22, 2  ;;  %v613_v22 = vld [vmem:[%s1563_s8 + $0x8] sm:$0xff] }
 0x486   :  { %528 = vrot.lane.b32.xlu2 %v1321_v49, %s1061_s18 }
 0x494   :  { %v1327_v3 = vpop.f32.mrf.mxu3  ;;  %v462_v36 = vpop.f32.mrf.mxu2 }
 0x495   :  { %497 = vrot.lane.b32.xlu0 %v1327_v3, %s1062_s4  ;;  %v469_v5 = vrot.slane %v1327_v3, 6  ;;  %v562_v55 = vrot.slane %v462_v36, 2 }
 0x497   :  { %v472_v14 = vsel %vm91_vm1, %v468_v7, %v469_v5  ;;  %v565_v59 = vsel %vm235_vm4, %v561_v57, %v562_v55 }
 0x498   :  { %v475_v17 = vmul.f32 %v472_v14, %v1178_v15  ;;  %v567_v63 = vmul.f32 %v565_v59, %v1211_v32 }
 0x49c   :  { %v1332_v6 = vpop.f32.mrf.mxu3  ;;  %v465_v48 = vpop.f32.mrf.mxu2 }
 0x49d   :  { %v470_v8 = vrot.slane %v1332_v6, 6  ;;  %530 = vrot.lane.b32.xlu0 %v1327_v3, %s1061_s18  ;;  %499 = vrot.lane.b32.xlu1 %v1332_v6, %s1062_s4  ;;  %v563_v56 = vrot.slane %v465_v48, 2 }
 0x49f   :  { %v473_v9 = vsel %vm91_vm1, %v470_v8, %v468_v7  ;;  %v471_v18 = vsel %vm91_vm1, %v469_v5, %v470_v8  ;;  %v564_v58 = vsel %vm235_vm4, %v562_v55, %v563_v56  ;;  %v566_v61 = vsel %vm235_vm4, %v563_v56, %v561_v57 }
 0x4a0   :  { %v474_v10 = vmul.f32 %v473_v9, %v1188_v21  ;;  %v476_v19 = vmul.f32 %v471_v18, %v1192_v23  ;;  %v568_v62 = vmul.f32 %v564_v58, %v1244_v0  ;;  %v569_v1 = vmul.f32 %v566_v61, %v1248_v4  ;;  %v614_v18 = vld [vmem:[%s1563_s8 + $0x10] sm:$0xff] }
 0x4a2   :  { %480 = vrot.lane.b32.xlu2 %v474_v10, %s1060_s17 }
 0x4a5   :  { %482 = vrot.lane.b32.xlu0 %v475_v17, %s1060_s17  ;;  %532 = vrot.lane.b32.xlu1 %v1332_v6, %s1061_s18  ;;  %v615_v17 = vld [vmem:[%s1563_s8 + $0x18] sm:$0xff] }
 0x4a6   :  { %634 = vmatpush.msra.mxu1 %v615_v17  ;;  %v672_v17 = vld [vmem:[%s1564_s9 + $0x8] sm:$0xff] }
 0x4a8   :  { %635 = vmatpush.msra.mxu1 %v614_v18  ;;  %v671_v18 = vld [vmem:[%s1564_s9] sm:$0xff] }
 0x4aa   :  { %636 = vmatpush.msra.mxu1 %v613_v22 }
 0x4ad   :  { %484 = vrot.lane.b32.xlu1 %v476_v19, %s1060_s17 }
 0x4d8   :  { %v496_v20 = vpop.permute.xlu2 %495 }
 0x4d9   :  { %v504_v25 = vrot.slane %v496_v20, 7 }
 0x4e0   :  { %v529_v35 = vpop.permute.xlu2 %528 }
 0x4e1   :  { %v537_v11 = vrot.slane %v529_v35, 1 }
 0x4fc   :  { %v481_v2 = vpop.permute.xlu2 %480 }
 0x4fd   :  { %v489_v10 = vadd.f32 %v481_v2, %v1321_v49 }
 0x507   :  { %v498_v24 = vpop.permute.xlu0 %497 }
 0x508   :  { %v505_v26 = vrot.slane %v498_v24, 7 }
 0x50a   :  { %v508_v27 = vsel %vm143_vm2, %v504_v25, %v505_v26 }
 0x50b   :  { %v511_v34 = vmul.f32 %v508_v27, %v1203_v28 }
 0x50d   :  { %518 = vrot.lane.b32.xlu0 %v511_v34, %s1060_s17 }
 0x50f   :  { %v531_v37 = vpop.permute.xlu0 %530  ;;  %v500_v38 = vpop.permute.xlu1 %499 }
 0x510   :  { %v538_v40 = vrot.slane %v531_v37, 1  ;;  %v506_v41 = vrot.slane %v500_v38, 7 }
 0x512   :  { %v541_v42 = vsel %vm189_vm3, %v537_v11, %v538_v40  ;;  %v507_v44 = vsel %vm143_vm2, %v505_v26, %v506_v41  ;;  %v509_v13 = vsel %vm143_vm2, %v506_v41, %v504_v25  ;;  %v612_v26 = vld [vmem:[%s1563_s8] sm:$0xff] }
 0x513   :  { %v543_v45 = vmul.f32 %v541_v42, %v1205_v29  ;;  %v512_v12 = vmul.f32 %v507_v44, %v1213_v33  ;;  %v510_v53 = vmul.f32 %v509_v13, %v1207_v30  ;;  %637 = vmatpush.msra.mxu1 %v612_v26 }
 0x515   :  { %549 = vrot.lane.b32.xlu2 %v543_v45, %s1060_s17  ;;  %520 = vrot.lane.b32.xlu1 %v512_v12, %s1060_s17 }
 0x516   :  { %690 = vmatpush.msrb.mxu1 %v672_v17  ;;  %v17_v17 = vstv %s1567_s11 }
 0x517   :  { %v533_v46 = vpop.permute.xlu1 %532  ;;  %v483_v43 = vpop.permute.xlu0 %482  ;;  %18 = vst [vmem:[#allocation2] sm:$0x1] %v17_v17 }
 0x518   :  { %v539_v47 = vrot.slane %v533_v46, 1  ;;  %v490_v49 = vadd.f32 %v483_v43, %v1327_v3  ;;  %691 = vmatpush.msrb.mxu1 %v671_v18 }
 0x51a   :  { %v540_v50 = vsel %vm189_vm3, %v538_v40, %v539_v47  ;;  %v542_v51 = vsel %vm189_vm3, %v539_v47, %v537_v11 }
 0x51b   :  { %v544_v52 = vmul.f32 %v540_v50, %v1209_v31  ;;  %v545_v54 = vmul.f32 %v542_v51, %v1235_v60 }
 0x51d   :  { %551 = vrot.lane.b32.xlu0 %v544_v52, %s1060_s17  ;;  %516 = vrot.lane.b32.xlu2 %v510_v53, %s1060_s17 }
 0x51e   :  { %553 = vrot.lane.b32.xlu1 %v545_v54, %s1060_s17 }
 0x51f   :  { %v485_v5 = vpop.permute.xlu1 %484 }
 0x520   :  { %v491_v27 = vadd.f32 %v485_v5, %v1332_v6 }
 0x525   :  { %575 = vrot.lane.b32.xlu0 %v568_v62, %s1060_s17  ;;  %573 = vrot.lane.b32.xlu2 %v567_v63, %s1060_s17 }
 0x526   :  { %577 = vrot.lane.b32.xlu1 %v569_v1, %s1060_s17 }
 0x56f   :  { %v550_v39 = vpop.permute.xlu2 %549 }
 0x577   :  { %v517_v7 = vpop.permute.xlu2 %516 }
 0x578   :  { %v525_v14 = vadd.f32 %v517_v7, %v489_v10 }
 0x57a   :  { %v558_v25 = vadd.f32 %v550_v39, %v525_v14 }
 0x57f   :  { %v519_v8 = vpop.permute.xlu0 %518  ;;  %v574_v24 = vpop.permute.xlu2 %573 }
 0x580   :  { %v526_v34 = vadd.f32 %v519_v8, %v490_v49  ;;  %v1405_v35 = vadd.f32 %v574_v24, %v558_v25 }
 0x582   :  { %v597_v3 = vmul.f32 %v1405_v35, %v1405_v35  ;;  %v586_v6 = vsel %vm585_vm11, %v1405_v35, 0.0 }
 0x584   :  { %v600_v47 = vsel %vm585_vm11, %v597_v3, 0.0 }
 0x587   :  { %v521_v9 = vpop.permute.xlu1 %520 }
 0x588   :  { %v527_v36 = vadd.f32 %v521_v9, %v491_v27 }
 0x58f   :  { %v552_v19 = vpop.permute.xlu0 %551 }
 0x590   :  { %v554_v20 = vpop.permute.xlu1 %553  ;;  %v559_v37 = vadd.f32 %v552_v19, %v526_v34  ;;  %v649_v34 = vld [vmem:[%s1565_s7] sm:$0x3] }
 0x591   :  { %v560_v38 = vadd.f32 %v554_v20, %v527_v36 }
 0x597   :  { %v576_v11 = vpop.permute.xlu0 %575 }
 0x598   :  { %v1409_v40 = vadd.f32 %v576_v11, %v559_v37  ;;  %v578_v41 = vpop.permute.xlu1 %577 }
 0x599   :  { %v1411_v42 = vadd.f32 %v578_v41, %v560_v38 }
 0x59a   :  { %v587_v44 = vsel %vm585_vm11, %v1409_v40, 0.0  ;;  %v598_v45 = vmul.f32 %v1409_v40, %v1409_v40 }
 0x59b   :  { %v588_v12 = vadd.f32 %v587_v44, %v586_v6  ;;  %v599_v46 = vmul.f32 %v1411_v42, %v1411_v42  ;;  %v589_v48 = vsel %vm585_vm11, %v1411_v42, 0.0 }
 0x59c   :  { %v601_v13 = vsel %vm585_vm11, %v598_v45, 0.0 }
 0x59d   :  { %v602_v50 = vadd.f32 %v601_v13, %v600_v47  ;;  %v590_v51 = vadd.f32 %v589_v48, %v588_v12  ;;  %v603_v52 = vsel %vm585_vm11, %v599_v46, 0.0  ;;  %v718_v46 = vld [vmem:[%s1566_s10 + $0x18] sm:$0xff]  ;;  %v717_v47 = vld [vmem:[%s1566_s10 + $0x10] sm:$0xff]  ;;  %v716_v13 = vld [vmem:[%s1566_s10 + $0x8] sm:$0xff] }
 0x59e   :  { %746 = vmatpush.msrb.mxu0 %v718_v46  ;;  %v715_v48 = vld [vmem:[%s1566_s10] sm:$0xff]  ;;  %s1063_s10 = smov 126  }
 0x59f   :  { %v591_v53 = vrot.slane %v590_v51, 4  ;;  %v604_v54 = vadd.f32 %v603_v52, %v602_v50 }
 0x5a0   :  { %747 = vmatpush.msrb.mxu0 %v717_v47 }
 0x5a1   :  { %v592_v55 = vadd.f32 %v591_v53, %v590_v51  ;;  %v605_v56 = vrot.slane %v604_v54, 4 }
 0x5a2   :  { %748 = vmatpush.msrb.mxu0 %v716_v13 }
 0x5a3   :  { %v593_v57 = vrot.slane %v592_v55, 2  ;;  %v606_v58 = vadd.f32 %v605_v56, %v604_v54 }
 0x5a4   :  { %749 = vmatpush.msrb.mxu0 %v715_v48 }
 0x5a5   :  { %v594_v59 = vadd.f32 %v593_v57, %v592_v55  ;;  %v607_v61 = vrot.slane %v606_v58, 2 }
 0x5a7   :  { %v595_v62 = vrot.slane %v594_v59, 1  ;;  %v608_v63 = vadd.f32 %v607_v61, %v606_v58 }
 0x5a9   :  { %v609_v1 = vrot.slane %v608_v63, 1  ;;  %v596_v2 = vadd.f32 %v595_v62, %v594_v59 }
 0x5ab   :  { %v610_v39 = vadd.f32 %v609_v1, %v608_v63 }
 0x5ad   :  { %v611_v43 = vsel %vm295_vm6, %v596_v2, %v610_v39 }
 0x5ae   :  { %617 = vrot.lane.b32.xlu2 %v611_v43, %s1060_s17 }
 0x608   :  { %v618_v5 = vpop.permute.xlu2 %617 }
 0x609   :  { %999 = vmatmul.msk.f32.vlgmr.msra.gmra.mxu1 %vm619_vm12, %v618_v5 }
 0x686   :  { %v639_v7 = vpop.f32.mrf.mxu1 }
 0x687   :  { %v642_v8 = vmul.f32 0.020833334, %v639_v7 }
 0x689   :  { %v643_v9 = vmul.f32 %v642_v8, %v642_v8 }
 0x68b   :  { %v645_v10 = vrot.slane %v643_v9, 7 }
 0x68d   :  { %v647_v14 = vsub.f32 %v642_v8, %v645_v10 }
 0x68f   :  { %v648_v19 = vmax.f32 %v647_v14, 0.0 }
 0x691   :  { %v650_v20 = vadd.f32 1e-05, %v648_v19 }
 0x693   :  { %1037 = vrsqrt.f32 %v650_v20  ;;  %vm657_vm14 = vweird.f32 %v650_v20 }
 0x699   :  { %v1038_v22 = vpop.eup %1037 }
 0x69a   :  { %v652_v24 = vmul.f32 %v1038_v22, %v650_v20  ;;  %vm658_vm13 = vweird.f32 %v1038_v22 }
 0x69b   :  { %vm659_vm15 = vmor %vm657_vm14, %vm658_vm13 }
 0x69c   :  { %v653_v49 = vmul.f32 %v1038_v22, %v652_v24 }
 0x69e   :  { %v654_v25 = vmul.f32 0.5, %v653_v49 }
 0x6a0   :  { %v655_v26 = vsub.f32 1.5, %v654_v25 }
 0x6a2   :  { %v656_v27 = vmul.f32 %v1038_v22, %v655_v26 }
 0x6a4   :  { %v660_v36 = vsel %vm659_vm15, %v1038_v22, %v656_v27 }
 0x6a5   :  { %v662_v37 = vrot.slane %v660_v36, 1 }
 0x6a7   :  { %v664_v38 = vmul.f32 %v662_v37, %v649_v34 }
 0x6a9   :  { %v665_v11 = vmul.f32 %v664_v38, %v642_v8 }
 0x6ab   :  { %v667_v3 = vrot.slane %v665_v11, 7 }
 0x6ad   :  { %v669_v41 = vsub.f32 %v649_v34, %v667_v3 }
 0x6af   :  { %v670_v6 = vsel %vm295_vm6, %v664_v38, %v669_v41 }
 0x6b0   :  { %1000 = vmatmul.msk.f32.vlgmr.msrb.gmra.mxu1 %vm302_vm7, %v670_v6 }
 0x72d   :  { %v693_v44 = vpop.f32.mrf.mxu1 }
 0x72e   :  { %v696_v45 = vperm.slane %v693_v44, 0  ;;  %v704_v12 = vperm.slane %v693_v44, 1 }
 0x730   :  { %706 = vrot.lane.b32.xlu1 %v704_v12, %s1060_s17  ;;  %698 = vrot.lane.b32.xlu0 %v696_v45, %s1060_s17 }
 0x7a2   :  { %v699_v50 = vpop.permute.xlu0 %698  ;;  %v707_v54 = vpop.permute.xlu1 %706 }
 0x7a3   :  { %v701_v51 = vmul.f32 %v699_v50, %v1405_v35  ;;  %v702_v52 = vmul.f32 %v699_v50, %v1409_v40  ;;  %v703_v53 = vmul.f32 %v699_v50, %v1411_v42 }
 0x7a5   :  { %v711_v55 = vadd.f32 %v707_v54, %v703_v53  ;;  %v710_v56 = vadd.f32 %v707_v54, %v702_v52  ;;  %v709_v57 = vadd.f32 %v707_v54, %v701_v51  ;;  %v1034_v54 = vld [vmem:[#allocation2] ss:$0 sm:$0xff] }
 0x7a7   :  { %v714_v58 = vmax.f32 %v711_v55, 0.0  ;;  %v713_v59 = vmax.f32 %v710_v56, 0.0  ;;  %v712_v61 = vmax.f32 %v709_v57, 0.0  ;;  %v1051_v55 = vld [vmem:[%s1558_s1] sm:$0xff] }
 0x7a9   :  { %726 = vrot.lane.b32.xlu1 %v714_v58, %s1060_s17  ;;  %724 = vrot.lane.b32.xlu0 %v713_v59, %s1060_s17 }
 0x7aa   :  { %722 = vrot.lane.b32.xlu2 %v712_v61, %s1060_s17  ;;  %s1066_s17 = smov 4  }
 0x804   :  { %v723_v62 = vpop.permute.xlu2 %722 }
 0x805   :  { %1001 = vmatmul.msk.f32.vlgmr.msrb.gmra.mxu0 %vm619_vm12, %v723_v62 }
 0x81b   :  { %v725_v35 = vpop.permute.xlu0 %724  ;;  %v727_v40 = vpop.permute.xlu1 %726 }
 0x81c   :  { %1002 = vmatmul.msk.f32.gmra.mxu0 %vm619_vm12, %v725_v35 }
 0x824   :  { %1003 = vmatmul.msk.f32.gmra.mxu0 %vm619_vm12, %v727_v40  ;;  %vm980_vm12 = vcmask 15360  }
 0x882   :  { %v1463_v42 = vpop.f32.mrf.mxu0 }
 0x883   :  { %787 = vrot.lane.b32.xlu2 %v1463_v42, %s1063_s10  ;;  %v760_v2 = vrot.slane %v1463_v42, 6 }
 0x88b   :  { %820 = vrot.lane.b32.xlu2 %v1463_v42, %s1064_s2 }
 0x893   :  { %853 = vrot.lane.b32.xlu2 %v1463_v42, %s1065_s29 }
 0x899   :  { %v1468_v63 = vpop.f32.mrf.mxu0 }
 0x89a   :  { %789 = vrot.lane.b32.xlu0 %v1468_v63, %s1063_s10  ;;  %v761_v7 = vrot.slane %v1468_v63, 6 }
 0x89c   :  { %v764_v8 = vsel %vm91_vm1, %v760_v2, %v761_v7 }
 0x89d   :  { %v767_v9 = vmul.f32 %v764_v8, %v1178_v15 }
 0x8a1   :  { %v1471_v1 = vpop.f32.mrf.mxu0 }
 0x8a2   :  { %v762_v39 = vrot.slane %v1471_v1, 6  ;;  %822 = vrot.lane.b32.xlu0 %v1468_v63, %s1064_s2  ;;  %791 = vrot.lane.b32.xlu1 %v1471_v1, %s1063_s10 }
 0x8a4   :  { %v765_v43 = vsel %vm91_vm1, %v762_v39, %v760_v2 }
 0x8a5   :  { %v766_v5 = vmul.f32 %v765_v43, %v1188_v21  ;;  %v763_v21 = vsel %vm91_vm1, %v761_v7, %v762_v39 }
 0x8a6   :  { %v768_v10 = vmul.f32 %v763_v21, %v1192_v23  ;;  %v1067_v23 = vmov 5  }
 0x8a7   :  { %772 = vrot.lane.b32.xlu2 %v766_v5, %s1066_s17  ;;  %1031 = vset.pattern.permute.xlu0 %v1067_v23 }
 0x8a8   :  { %1032 = vset.pattern.permute.xlu1 %v1067_v23 }
 0x8aa   :  { %855 = vrot.lane.b32.xlu0 %v1468_v63, %s1065_s29  ;;  %824 = vrot.lane.b32.xlu1 %v1471_v1, %s1064_s2 }
 0x8b2   :  { %774 = vrot.lane.b32.xlu0 %v767_v9, %s1066_s17  ;;  %857 = vrot.lane.b32.xlu1 %v1471_v1, %s1065_s29 }
 0x8ba   :  { %776 = vrot.lane.b32.xlu1 %v768_v10, %s1066_s17 }
 0x8dd   :  { %v788_v14 = vpop.permute.xlu2 %787 }
 0x8de   :  { %v796_v19 = vrot.slane %v788_v14, 7 }
 0x8e5   :  { %v821_v22 = vpop.permute.xlu2 %820 }
 0x8e6   :  { %v829_v26 = vrot.slane %v821_v22, 1 }
 0x8ed   :  { %v854_v11 = vpop.permute.xlu2 %853 }
 0x8ee   :  { %v862_v6 = vrot.slane %v854_v11, 2 }
 0x90c   :  { %v790_v18 = vpop.permute.xlu0 %789 }
 0x90d   :  { %v797_v15 = vrot.slane %v790_v18, 7 }
 0x90f   :  { %v800_v20 = vsel %vm143_vm2, %v796_v19, %v797_v15 }
 0x910   :  { %v803_v24 = vmul.f32 %v800_v20, %v1203_v28 }
 0x912   :  { %810 = vrot.lane.b32.xlu0 %v803_v24, %s1066_s17 }
 0x914   :  { %v823_v49 = vpop.permute.xlu0 %822  ;;  %v792_v25 = vpop.permute.xlu1 %791 }
 0x915   :  { %v830_v27 = vrot.slane %v823_v49, 1  ;;  %v798_v34 = vrot.slane %v792_v25, 7 }
 0x917   :  { %v833_v36 = vsel %vm189_vm3, %v829_v26, %v830_v27  ;;  %v799_v37 = vsel %vm143_vm2, %v797_v15, %v798_v34  ;;  %v801_v51 = vsel %vm143_vm2, %v798_v34, %v796_v19 }
 0x918   :  { %v835_v38 = vmul.f32 %v833_v36, %v1205_v29  ;;  %v804_v28 = vmul.f32 %v799_v37, %v1213_v33 }
 0x91a   :  { %841 = vrot.lane.b32.xlu2 %v835_v38, %s1066_s17  ;;  %812 = vrot.lane.b32.xlu1 %v804_v28, %s1066_s17 }
 0x91c   :  { %v856_v3 = vpop.permute.xlu0 %855  ;;  %v825_v41 = vpop.permute.xlu1 %824 }
 0x91d   :  { %v863_v44 = vrot.slane %v856_v3, 2  ;;  %v831_v45 = vrot.slane %v825_v41, 1 }
 0x91f   :  { %v832_v12 = vsel %vm189_vm3, %v830_v27, %v831_v45  ;;  %v866_v46 = vsel %vm235_vm4, %v862_v6, %v863_v44  ;;  %v834_v29 = vsel %vm189_vm3, %v831_v45, %v829_v26 }
 0x920   :  { %v836_v33 = vmul.f32 %v832_v12, %v1209_v31  ;;  %v868_v47 = vmul.f32 %v866_v46, %v1211_v32  ;;  %v837_v13 = vmul.f32 %v834_v29, %v1235_v60  ;;  %v802_v60 = vmul.f32 %v801_v51, %v1207_v30  ;;  %v1053_v30 = vld [vmem:[%s1558_s1 + $0x10] sm:$0xff]  ;;  %s1068_s1 = smov 124  }
 0x922   :  { %843 = vrot.lane.b32.xlu0 %v836_v33, %s1066_s17  ;;  %874 = vrot.lane.b32.xlu2 %v868_v47, %s1066_s17 }
 0x923   :  { %845 = vrot.lane.b32.xlu1 %v837_v13, %s1066_s17 }
 0x924   :  { %v858_v48 = vpop.permute.xlu1 %857  ;;  %v775_v58 = vpop.permute.xlu0 %774 }
 0x925   :  { %v864_v50 = vrot.slane %v858_v48, 2  ;;  %v782_v10 = vadd.f32 %v775_v58, %v1468_v63 }
 0x927   :  { %v865_v52 = vsel %vm235_vm4, %v863_v44, %v864_v50  ;;  %v867_v31 = vsel %vm235_vm4, %v864_v50, %v862_v6 }
 0x928   :  { %v869_v32 = vmul.f32 %v865_v52, %v1244_v0  ;;  %v870_v53 = vmul.f32 %v867_v31, %v1248_v4  ;;  %v773_v0 = vpop.permute.xlu2 %772 }
 0x929   :  { %v781_v57 = vadd.f32 %v773_v0, %v1463_v42 }
 0x92a   :  { %876 = vrot.lane.b32.xlu0 %v869_v32, %s1066_s17  ;;  %808 = vrot.lane.b32.xlu2 %v802_v60, %s1066_s17 }
 0x92b   :  { %878 = vrot.lane.b32.xlu1 %v870_v53, %s1066_s17 }
 0x92c   :  { %v777_v59 = vpop.permute.xlu1 %776 }
 0x92d   :  { %v783_v14 = vadd.f32 %v777_v59, %v1471_v1 }
 0x932   :  { %890 = vperm.xlu2 %1030, %v1034_v54   ;;  %954 = vperm.xlu0 %1031, %v1051_v55  }
 0x933   :  { %958 = vperm.xlu1 %1032, %v1052_v16  }
 0x93a   :  { %1033 = vset.pattern.permute.xlu2 %v1067_v23 }
 0x93b   :  { %962 = vperm.xlu2 %1033, %v1053_v30  }
 0x974   :  { %v842_v4 = vpop.permute.xlu2 %841 }
 0x97c   :  { %v875_v56 = vpop.permute.xlu2 %874 }
 0x984   :  { %v809_v61 = vpop.permute.xlu2 %808  ;;  %v811_v40 = vpop.permute.xlu0 %810 }
 0x985   :  { %v817_v62 = vadd.f32 %v809_v61, %v781_v57  ;;  %v818_v17 = vadd.f32 %v811_v40, %v782_v10 }
 0x987   :  { %v850_v35 = vadd.f32 %v842_v4, %v817_v62 }
 0x989   :  { %v883_v2 = vadd.f32 %v875_v56, %v850_v35 }
 0x98c   :  { %v891_v39 = vpop.permute.xlu2 %890  ;;  %v813_v43 = vpop.permute.xlu1 %812 }
 0x98d   :  { %v893_v5 = vadd.f32 %v891_v39, %v883_v2  ;;  %v819_v19 = vadd.f32 %v813_v43, %v783_v14 }
 0x98f   :  { %v896_v7 = vsub.f32 0.0, %v893_v5 }
 0x991   :  { %v899_v8 = vmul.f32 1.442695, %v896_v7 }
 0x993   :  { %1039 = vpow2.f32 %v899_v8 }
 0x994   :  { %v844_v9 = vpop.permute.xlu0 %843 }
 0x995   :  { %v846_v21 = vpop.permute.xlu1 %845  ;;  %v851_v15 = vadd.f32 %v844_v9, %v818_v17  ;;  %v963_v40 = vpop.permute.xlu2 %962 }
 0x996   :  { %v852_v20 = vadd.f32 %v846_v21, %v819_v19 }
 0x999   :  { %v1040_v42 = vpop.eup %1039 }
 0x99a   :  { %v905_v18 = vadd.f32 1.0, %v1040_v42 }
 0x99c   :  { %1041 = vrcp.f32 %v905_v18  ;;  %v877_v22 = vpop.permute.xlu0 %876  ;;  %v919_v28 = vand.u32 2147483648, %v905_v18  ;;  %v917_v3 = vand.u32 2147483647, %v905_v18  ;;  %vm913_vm1 = vweird.f32 %v905_v18 }
 0x99d   :  { %v884_v24 = vadd.f32 %v877_v22, %v851_v15  ;;  %v879_v23 = vpop.permute.xlu1 %878 }
 0x99e   :  { %v885_v49 = vadd.f32 %v879_v23, %v852_v20  ;;  %v920_v6 = vor.u32 1.1754944e-38, %v919_v28  ;;  %vm918_vm3 = vcmp.eq.f32.partialorder %v917_v3, 8.507059e+37 }
 0x99f   :  { %v894_v25 = vadd.f32 %v891_v39, %v884_v24 }
 0x9a0   :  { %v895_v26 = vadd.f32 %v891_v39, %v885_v49 }
 0x9a1   :  { %v897_v27 = vsub.f32 0.0, %v894_v25 }
 0x9a2   :  { %v1042_v34 = vpop.eup %1041  ;;  %v898_v36 = vsub.f32 0.0, %v895_v26 }
 0x9a3   :  { %v901_v37 = vmul.f32 1.442695, %v897_v27  ;;  %v909_v63 = vmul.f32 %v1042_v34, %v905_v18  ;;  %vm914_vm0 = vweird.f32 %v1042_v34 }
 0x9a4   :  { %v903_v38 = vmul.f32 1.442695, %v898_v36  ;;  %vm915_vm2 = vmor %vm913_vm1, %vm914_vm0  ;;  %v955_v29 = vpop.permute.xlu0 %954 }
 0x9a5   :  { %1043 = vpow2.f32 %v901_v37  ;;  %v910_v1 = vsub.f32 1.0, %v909_v63  ;;  %v959_v35 = vpop.permute.xlu1 %958 }
 0x9a6   :  { %1045 = vpow2.f32 %v903_v38 }
 0x9a7   :  { %v911_v11 = vmul.f32 %v1042_v34, %v910_v1 }
 0x9a9   :  { %v912_v41 = vadd.f32 %v1042_v34, %v911_v11 }
 0x9ab   :  { %v1044_v44 = vpop.eup %1043  ;;  %v916_v45 = vsel %vm915_vm2, %v1042_v34, %v912_v41 }
 0x9ac   :  { %v1046_v12 = vpop.eup %1045  ;;  %v906_v46 = vadd.f32 1.0, %v1044_v44  ;;  %v921_v33 = vsel %vm918_vm3, %v920_v6, %v916_v45 }
 0x9ad   :  { %v907_v47 = vadd.f32 1.0, %v1046_v12  ;;  %v950_v13 = vmul.f32 5.0, %v921_v33 }
 0x9ae   :  { %1047 = vrcp.f32 %v906_v46  ;;  %v933_v53 = vand.u32 2147483648, %v906_v46  ;;  %v931_v16 = vand.u32 2147483647, %v906_v46  ;;  %vm927_vm6 = vweird.f32 %v906_v46 }
 0x9af   :  { %1049 = vrcp.f32 %v907_v47  ;;  %v965_v48 = vmul.f32 %v955_v29, %v950_v13  ;;  %v947_v54 = vand.u32 2147483648, %v907_v47  ;;  %v945_v0 = vand.u32 2147483647, %v907_v47 }
 0x9b0   :  { %vm941_vm7 = vweird.f32 %v907_v47  ;;  %v934_v57 = vor.u32 1.1754944e-38, %v933_v53  ;;  %vm932_vm10 = vcmp.eq.f32.partialorder %v931_v16, 8.507059e+37 }
 0x9b1   :  { %971 = vrot.lane.b32.xlu1 %v965_v48, %s1068_s1  ;;  %v948_v58 = vor.u32 1.1754944e-38, %v947_v54  ;;  %vm946_vm11 = vcmp.eq.f32.partialorder %v945_v0, 8.507059e+37 }
 0x9b4   :  { %v1048_v50 = vpop.eup %1047 }
 0x9b5   :  { %v1050_v51 = vpop.eup %1049  ;;  %v923_v52 = vmul.f32 %v1048_v50, %v906_v46  ;;  %vm928_vm4 = vweird.f32 %v1048_v50 }
 0x9b6   :  { %v937_v31 = vmul.f32 %v1050_v51, %v907_v47  ;;  %vm942_vm5 = vweird.f32 %v1050_v51  ;;  %vm929_vm8 = vmor %vm927_vm6, %vm928_vm4 }
 0x9b7   :  { %v924_v32 = vsub.f32 1.0, %v923_v52  ;;  %vm943_vm9 = vmor %vm941_vm7, %vm942_vm5 }
 0x9b8   :  { %v938_v60 = vsub.f32 1.0, %v937_v31 }
 0x9b9   :  { %v925_v55 = vmul.f32 %v1048_v50, %v924_v32 }
 0x9ba   :  { %v939_v30 = vmul.f32 %v1050_v51, %v938_v60 }
 0x9bb   :  { %v926_v4 = vadd.f32 %v1048_v50, %v925_v55 }
 0x9bc   :  { %v940_v56 = vadd.f32 %v1050_v51, %v939_v30 }
 0x9bd   :  { %v930_v59 = vsel %vm929_vm8, %v1048_v50, %v926_v4 }
 0x9be   :  { %v944_v61 = vsel %vm943_vm9, %v1050_v51, %v940_v56  ;;  %v935_v62 = vsel %vm932_vm10, %v934_v57, %v930_v59 }
 0x9bf   :  { %v949_v2 = vsel %vm946_vm11, %v948_v58, %v944_v61  ;;  %v951_v39 = vmul.f32 5.0, %v935_v62 }
 0x9c0   :  { %v952_v43 = vmul.f32 5.0, %v949_v2 }
 0x9c1   :  { %v966_v5 = vmul.f32 %v959_v35, %v951_v39 }
 0x9c2   :  { %v967_v7 = vmul.f32 %v963_v40, %v952_v43 }
 0x9c3   :  { %973 = vrot.lane.b32.xlu2 %v966_v5, %s1068_s1 }
 0x9c4   :  { %975 = vrot.lane.b32.xlu0 %v967_v7, %s1068_s1 }
 0xa1d   :  { %v974_v8 = vpop.permute.xlu2 %973 }
 0xa1e   :  { %982 = vst.msk [vmem:[%s1568_s12 + $0x8] sm:$0xff] %vm980_vm12, %v974_v8 }
 0xa23   :  { %v972_v9 = vpop.permute.xlu1 %971 }
 0xa24   :  { %981 = vst.msk [vmem:[%s1568_s12] sm:$0xff] %vm980_vm12, %v972_v9 }
 0xa36   :  { %v976_v21 = vpop.permute.xlu0 %975 }
 0xa37   :  { %983 = vst.msk [vmem:[%s1568_s12 + $0x10] sm:$0xff] %vm980_vm12, %v976_v21 }

</bundles_post_ra>
